<compile_context>
chip_gen: v7x
topology: tpu7x:2x2x1
jax: 0.10.0
libtpu: 0.0.40
codegen_flags: <defaults>
</compile_context>

<pallas_src>
import jax
import jax.numpy as jnp
from jax.experimental import pallas as pl
from jax.experimental.pallas import tpu as pltpu


def _mlp_kernel(x_ref, w1_ref, b1_ref, w2_ref, b2_ref, w3_ref, b3_ref, o_ref):
    # In-kernel bf16 cast of the streamed x tile (rides a VPU slot; x is read
    # from HBM only once, as f32).
    x = x_ref[...].astype(jnp.bfloat16)
    # Layer 1 on MXU (bf16 operands, f32 accumulate); bias + ReLU in f32 (VPU).
    h1 = jnp.dot(x, w1_ref[...], preferred_element_type=jnp.float32)
    h1 = jnp.maximum(h1 + b1_ref[...], 0.0)
    # Layer 2 on MXU.
    h2 = jnp.dot(h1.astype(jnp.bfloat16), w2_ref[...],
                 preferred_element_type=jnp.float32)
    h2 = jnp.maximum(h2 + b2_ref[...], 0.0)
    # Output layer (N=1) as (1, H) @ (tm, H)^T on the (otherwise idle) MXU so
    # the per-tile result lands lane-dense as a (1, tm) row.
    out_row = jax.lax.dot_general(
        w3_ref[...], h2.astype(jnp.bfloat16),
        dimension_numbers=(((1,), (1,)), ((), ())),
        preferred_element_type=jnp.float32)
    o_ref[...] = (out_row + b3_ref[...]).astype(o_ref.dtype)


def _round_up(x, m):
    return ((x + m - 1) // m) * m


def network_forward(input_tensor, params, *, cate_num, cate_dim, tile_m=1024):
    """Mirrors Network.forward: slice state/action (unused), run self.net."""
    state_dim = cate_num * (cate_dim - 1) * 2
    # The reference forward computes these slices but does not use them.
    state = input_tensor[:, :state_dim]
    action = input_tensor[:, state_dim:]
    del state, action

    w1, b1, w2, b2, w3, b3 = params
    B, D_in = input_tensor.shape
    H = w1.shape[1]

    # Tiny weights cast once to bf16 (native MXU operand path); biases stay f32.
    w1_bf = w1.astype(jnp.bfloat16)
    w2_bf = w2.astype(jnp.bfloat16)
    w3_row = w3.T.astype(jnp.bfloat16)          # (1, H): row form for the head
    b1_f = b1.astype(jnp.float32)
    b2_f = b2.astype(jnp.float32)
    b3_f = b3.astype(jnp.float32)               # (1, 1)

    # Batch tiling. No wrapper-side pad: the partial last tile is handled by
    # pallas_call (OOB input rows are don't-care; their outputs are sliced off).
    if B >= 256:
        # Multiple-of-128 tiles; cap so there are >= 2 tiles so both v7x
        # TensorCores get work under dimension_semantics=("parallel",).
        tm = max(128, min(_round_up(tile_m, 128),
                          _round_up(pl.cdiv(B, 2), 128)))
    else:
        tm = B                                   # single full-extent tile
    num_tiles = pl.cdiv(B, tm)
    B_pad = num_tiles * tm

    # Weights/biases: constant index_map -> VMEM-resident across grid steps.
    def _resident(shape):
        nd = len(shape)
        return pl.BlockSpec(shape, lambda i, _nd=nd: (0,) * _nd)

    out_row = pl.pallas_call(
        _mlp_kernel,
        out_shape=jax.ShapeDtypeStruct((1, B_pad), jnp.float32),
        grid=(num_tiles,),
        in_specs=[
            pl.BlockSpec((tm, D_in), lambda i: (i, 0)),   # x: streamed over batch (f32)
            _resident((D_in, H)),                         # w1
            _resident((1, H)),                            # b1
            _resident((H, H)),                            # w2
            _resident((1, H)),                            # b2
            _resident((1, H)),                            # w3 (row)
            _resident((1, 1)),                            # b3
        ],
        out_specs=pl.BlockSpec((1, tm), lambda i: (0, i)),  # lane-dense output row
        compiler_params=pltpu.CompilerParams(
            dimension_semantics=("parallel",),            # megacore on v7x
        ),
    )(input_tensor, w1_bf, b1_f, w2_bf, b2_f, w3_row, b3_f)

    return out_row[0, :B][:, None]


def init_params(key, d_in, hidden, d_out):
    """Deterministic parameter init (uniform, PyTorch-Linear-like scale)."""
    ks = jax.random.split(key, 6)

    def lin(kw, kb, fan_in, fan_out):
        bound = 1.0 / jnp.sqrt(jnp.float32(fan_in))
        w = jax.random.uniform(kw, (fan_in, fan_out), jnp.float32, -bound, bound)
        b = jax.random.uniform(kb, (1, fan_out), jnp.float32, -bound, bound)
        return w, b

    w1, b1 = lin(ks[0], ks[1], d_in, hidden)
    w2, b2 = lin(ks[2], ks[3], hidden, hidden)
    w3, b3 = lin(ks[4], ks[5], hidden, d_out)
    return (w1, b1, w2, b2, w3, b3)


if __name__ == "__main__":
    # cate_num=4, cate_dim=3 -> state_dim = 4*(3-1)*2 = 16, action_dim = 8,
    # so D_in = 24. Hidden = 32, output = 1 (Q-value).
    cate_num, cate_dim = 4, 3
    state_dim = cate_num * (cate_dim - 1) * 2
    action_dim = 8
    d_in = state_dim + action_dim
    hidden = 32
    d_out = 1
    batch = 300  # exercises the >=2-tile path (tm=256) plus a partial last tile

    key = jax.random.PRNGKey(0)
    k_x, k_p = jax.random.split(key)
    x = jax.random.normal(k_x, (batch, d_in), jnp.float32)
    params = init_params(k_p, d_in, hidden, d_out)

    out = network_forward(x, params, cate_num=cate_num, cate_dim=cate_dim)
    out = jax.block_until_ready(out)

    # Reference in plain JAX with the same bf16 rounding of operands.
    w1, b1, w2, b2, w3, b3 = params
    xr = x.astype(jnp.bfloat16).astype(jnp.float32)
    w1r = w1.astype(jnp.bfloat16).astype(jnp.float32)
    w2r = w2.astype(jnp.bfloat16).astype(jnp.float32)
    w3r = w3.astype(jnp.bfloat16).astype(jnp.float32)
    h1 = jnp.maximum(xr @ w1r + b1, 0.0)
    h2 = jnp.maximum(h1.astype(jnp.bfloat16).astype(jnp.float32) @ w2r + b2, 0.0)
    ref = h2.astype(jnp.bfloat16).astype(jnp.float32) @ w3r + b3

    assert out.shape == (batch, d_out)
    assert jnp.allclose(out, ref, atol=2e-2, rtol=2e-2)

    print("KERNEL_OK")
</pallas_src>

<mosaic_0001>
module attributes {stable_mosaic.version = 11 : i64} {
  func.func @_mlp_kernel(%arg0: i32, %arg1: memref<256x24xf32, #tpu.memory_space<vmem>>, %arg2: memref<24x32xbf16, #tpu.memory_space<vmem>>, %arg3: memref<1x32xf32, #tpu.memory_space<vmem>>, %arg4: memref<32x32xbf16, #tpu.memory_space<vmem>>, %arg5: memref<1x32xf32, #tpu.memory_space<vmem>>, %arg6: memref<1x32xbf16, #tpu.memory_space<vmem>>, %arg7: memref<1x1xf32, #tpu.memory_space<vmem>>, %arg8: memref<1x256xf32, #tpu.memory_space<vmem>>) attributes {dimension_semantics = [#tpu.dimension_semantics<parallel>], iteration_bounds = array<i64: 2>, scalar_prefetch = 0 : i64, scratch_operands = 0 : i64, tpu.core_type = #tpu.core_type<tc>, window_params = [{transform_indices = @transform_0, window_bounds = array<i64: 256, 24>}, {pipeline_mode = #tpu.pipeline_mode<synchronous>, transform_indices = @transform_1, window_bounds = array<i64: 24, 32>}, {pipeline_mode = #tpu.pipeline_mode<synchronous>, transform_indices = @transform_2, window_bounds = array<i64: 1, 32>}, {pipeline_mode = #tpu.pipeline_mode<synchronous>, transform_indices = @transform_3, window_bounds = array<i64: 32, 32>}, {pipeline_mode = #tpu.pipeline_mode<synchronous>, transform_indices = @transform_4, window_bounds = array<i64: 1, 32>}, {pipeline_mode = #tpu.pipeline_mode<synchronous>, transform_indices = @transform_5, window_bounds = array<i64: 1, 32>}, {pipeline_mode = #tpu.pipeline_mode<synchronous>, transform_indices = @transform_6, window_bounds = array<i64: 1, 1>}, {transform_indices = @transform_7, window_bounds = array<i64: 1, 256>}]} {
    %c0 = arith.constant 0 : index
    %c0_0 = arith.constant 0 : index
    %0 = vector.load %arg1[%c0, %c0_0] : memref<256x24xf32, #tpu.memory_space<vmem>>, vector<256x24xf32>
    %1 = arith.truncf %0 : vector<256x24xf32> to vector<256x24xbf16>
    %c0_1 = arith.constant 0 : index
    %c0_2 = arith.constant 0 : index
    %2 = vector.load %arg2[%c0_1, %c0_2] : memref<24x32xbf16, #tpu.memory_space<vmem>>, vector<24x32xbf16>
    %cst = arith.constant dense<0.000000e+00> : vector<256x32xf32>
    %3 = tpu.matmul %1, %2, %cst {dimension_numbers = #tpu.dot_dimension_numbers<[1], [0], [0], [1], [0, 0, 1, 1], [], []>} : vector<256x24xbf16>, vector<24x32xbf16>, vector<256x32xf32> -> vector<256x32xf32>
    %c0_3 = arith.constant 0 : index
    %c0_4 = arith.constant 0 : index
    %4 = vector.load %arg3[%c0_3, %c0_4] : memref<1x32xf32, #tpu.memory_space<vmem>>, vector<1x32xf32>
    %5 = vector.broadcast %4 : vector<1x32xf32> to vector<256x32xf32>
    %6 = arith.addf %3, %5 : vector<256x32xf32>
    %cst_5 = arith.constant 0.000000e+00 : f32
    %7 = vector.broadcast %cst_5 : f32 to vector<256x32xf32>
    %8 = arith.maximumf %6, %7 : vector<256x32xf32>
    %9 = arith.truncf %8 : vector<256x32xf32> to vector<256x32xbf16>
    %c0_6 = arith.constant 0 : index
    %c0_7 = arith.constant 0 : index
    %10 = vector.load %arg4[%c0_6, %c0_7] : memref<32x32xbf16, #tpu.memory_space<vmem>>, vector<32x32xbf16>
    %cst_8 = arith.constant dense<0.000000e+00> : vector<256x32xf32>
    %11 = tpu.matmul %9, %10, %cst_8 {dimension_numbers = #tpu.dot_dimension_numbers<[1], [0], [0], [1], [0, 0, 1, 1], [], []>} : vector<256x32xbf16>, vector<32x32xbf16>, vector<256x32xf32> -> vector<256x32xf32>
    %c0_9 = arith.constant 0 : index
    %c0_10 = arith.constant 0 : index
    %12 = vector.load %arg5[%c0_9, %c0_10] : memref<1x32xf32, #tpu.memory_space<vmem>>, vector<1x32xf32>
    %13 = vector.broadcast %12 : vector<1x32xf32> to vector<256x32xf32>
    %14 = arith.addf %11, %13 : vector<256x32xf32>
    %cst_11 = arith.constant 0.000000e+00 : f32
    %15 = vector.broadcast %cst_11 : f32 to vector<256x32xf32>
    %16 = arith.maximumf %14, %15 : vector<256x32xf32>
    %c0_12 = arith.constant 0 : index
    %c0_13 = arith.constant 0 : index
    %17 = vector.load %arg6[%c0_12, %c0_13] : memref<1x32xbf16, #tpu.memory_space<vmem>>, vector<1x32xbf16>
    %18 = arith.truncf %16 : vector<256x32xf32> to vector<256x32xbf16>
    %cst_14 = arith.constant dense<0.000000e+00> : vector<1x256xf32>
    %19 = tpu.matmul %17, %18, %cst_14 {dimension_numbers = #tpu.dot_dimension_numbers<[1], [1], [0], [0], [0, 0, 1, 0], [], []>} : vector<1x32xbf16>, vector<256x32xbf16>, vector<1x256xf32> -> vector<1x256xf32>
    %c0_15 = arith.constant 0 : index
    %c0_16 = arith.constant 0 : index
    %20 = vector.load %arg7[%c0_15, %c0_16] : memref<1x1xf32, #tpu.memory_space<vmem>>, vector<1x1xf32>
    %21 = vector.broadcast %20 : vector<1x1xf32> to vector<1x256xf32>
    %22 = arith.addf %19, %21 : vector<1x256xf32>
    %c0_17 = arith.constant 0 : index
    %c0_18 = arith.constant 0 : index
    %23 = vector.load %arg8[%c0_17, %c0_18] : memref<1x256xf32, #tpu.memory_space<vmem>>, vector<1x256xf32>
    tpu.vector_store %arg8[%c0_17, %c0_18], %22 {strides = array<i32>} : memref<1x256xf32, #tpu.memory_space<vmem>>, vector<1x256xf32>,
    return
  }
  func.func @transform_0(%arg0: i32) -> (i32, i32) {
    %c0_i32 = arith.constant 0 : i32
    %c0_i32_0 = arith.constant 0 : i32
    return %arg0, %c0_i32 : i32, i32
  }
  func.func @transform_1(%arg0: i32) -> (i32, i32) {
    %c0_i32 = arith.constant 0 : i32
    %c0_i32_0 = arith.constant 0 : i32
    %c0_i32_1 = arith.constant 0 : i32
    return %c0_i32, %c0_i32_0 : i32, i32
  }
  func.func @transform_2(%arg0: i32) -> (i32, i32) {
    %c0_i32 = arith.constant 0 : i32
    %c0_i32_0 = arith.constant 0 : i32
    %c0_i32_1 = arith.constant 0 : i32
    return %c0_i32, %c0_i32_0 : i32, i32
  }
  func.func @transform_3(%arg0: i32) -> (i32, i32) {
    %c0_i32 = arith.constant 0 : i32
    %c0_i32_0 = arith.constant 0 : i32
    %c0_i32_1 = arith.constant 0 : i32
    return %c0_i32, %c0_i32_0 : i32, i32
  }
  func.func @transform_4(%arg0: i32) -> (i32, i32) {
    %c0_i32 = arith.constant 0 : i32
    %c0_i32_0 = arith.constant 0 : i32
    %c0_i32_1 = arith.constant 0 : i32
    return %c0_i32, %c0_i32_0 : i32, i32
  }
  func.func @transform_5(%arg0: i32) -> (i32, i32) {
    %c0_i32 = arith.constant 0 : i32
    %c0_i32_0 = arith.constant 0 : i32
    %c0_i32_1 = arith.constant 0 : i32
    return %c0_i32, %c0_i32_0 : i32, i32
  }
  func.func @transform_6(%arg0: i32) -> (i32, i32) {
    %c0_i32 = arith.constant 0 : i32
    %c0_i32_0 = arith.constant 0 : i32
    %c0_i32_1 = arith.constant 0 : i32
    return %c0_i32, %c0_i32_0 : i32, i32
  }
  func.func @transform_7(%arg0: i32) -> (i32, i32) {
    %c0_i32 = arith.constant 0 : i32
    %c0_i32_0 = arith.constant 0 : i32
    return %c0_i32, %arg0 : i32, i32
  }
}

</mosaic_0001>

<bundles_post_ra>
// kernel: tpu_custom_call.1
= control target key start
LH: loop header
LB: loop body
LE: loop exit
PB: predicated region body
PF: predicated region fallthrough
CT: control target
= control target key end

     0   :  { %s1756_s0 = inlined_call_operand.vmem [shape: f32[300,24], index: 0, kind: input, shape index: {}]   ;;  %s1757_s1 = inlined_call_operand.vmem [shape: bf16[24,32], index: 1, kind: input, shape index: {}]   ;;  %s1758_s2 = inlined_call_operand.vmem [shape: f32[1,32], index: 2, kind: input, shape index: {}]   ;;  %s1759_s3 = inlined_call_operand.vmem [shape: bf16[32,32], index: 3, kind: input, shape index: {}]   ;;  %s1760_s4 = inlined_call_operand.vmem [shape: f32[1,32], index: 4, kind: input, shape index: {}]   ;;  %s1761_s5 = inlined_call_operand.vmem [shape: bf16[1,32], index: 5, kind: input, shape index: {}]   ;;  %s1762_s6 = inlined_call_operand.<no memory space> [shape: f32[1,1], index: 6, kind: input, shape index: {}]   ;;  %s1763_s7 = inlined_call_operand.hbm [shape: f32[1,512], index: 7, kind: output, shape index: {}]  }
   0x1   :  { %v12_v0 = vstv %s1762_s6 }
   0x2   :  { %13 = vst [vmem:[#allocation2] sm:$0x1] %v12_v0 }
   0x3   :  { %14 = vsyncpa [#allocation4], 0 }
   0x4   :  { %16 = vsyncpa [#allocation4 + $0x1], 0  ;;  %s1456_s26 = smov 0   ;;  %s1458_s27 = smov 0  }
   0x5   :  { %s1460_s28 = smov 0   ;;  %s1462_s29 = smov 0  }
   0x6 LB: > { %s1112_s6 = sadd.s32 4294967295, %s1408_s29   ;;  %s1113_s30 = sadd.s32 4294967294, %s1408_s29   ;;  %s1408_s29 = sphi %s1462_s29, %s1769_s29   ;;  %s1404_s28 = sphi %s1460_s28, %s1768_s28   ;;  %s1400_s27 = sphi %s1458_s27, %s1767_s27   ;;  %s1396_s26 = sphi %s1456_s26, %s1766_s26  }
   0x7   : > { %s1479_s8 = sadd.s32 1, %s1408_s29   ;;  %s181_s9 = sadd.s32 1, %s1404_s28 }
   0x8   : > { %s178_s10 = ssub.s32 %s1408_s29, %s1479_s8  ;;  %p191_p0 = scmp.ne.s32.totalorder %s1404_s28, %s1400_s27 }
   0x9   : > { %p179_p1 = scmp.eq.s32.totalorder %s178_s10, 0  ;;  %p192_p2 = scmp.eq.s32.totalorder %s1112_s6, 1 }
   0xa   : > { %p197_p3 = scmp.ne.s32.totalorder %s1400_s27, %s1396_s26  ;;  %p198_p4 = scmp.eq.s32.totalorder %s1113_s30, 1 }
   0xb   : > { %s1489_s11 = scalar_select %p179_p1, %s1404_s28, %s181_s9  }
   0xc   : > { %p1491_p5 = por %p192_p2, %p191_p0  ;;  %p1495_p6 = por %p198_p4, %p197_p3 }
   0xd   : > { %p1116_p7 = scmp.ge.s32.totalorder %s1408_s29, 1  ;;  %p251_p8 = scmp.lt.s32.totalorder %s1408_s29, 3 }
   0xf   : > { %p252_p9 = pnand %p1116_p7, %p251_p8 }
  0x10   : > { %v1342_v1 = vld [vmem:[%s1757_s1] sm:$0xff] (!%p252_p9)   ;;  %v1343_v2 = vld [vmem:[%s1757_s1 + $0x8] ss:$0 sps:$4 sm:$0xff] (!%p252_p9)   ;;  %vm419_vm0 = vcmask (!%p252_p9), 1043456   ;;  %s1507_s18 = sshll.u32 (!%p252_p9), %s1112_s6, 5  ;;  %vm370_vm1 = vcmask (!%p252_p9), 195584  }
  0x11   : > { %255 = sbr.rel (%p252_p9) target bundleno = 806 (0x326), region = 48  ;;  %1219 = vmatprep.subr.bf16.mxu0 (!%p252_p9), %v1342_v1  ;;  %p292_p10 = scmp.lt.s32.totalorder (!%p252_p9), %s1507_s18, 37  ;;  %v421_v3 = vsel (!%p252_p9), %vm419_vm0, %v1343_v2, 0  ;;  %v1344_v52 = vld [vmem:[%s1759_s3] sm:$0xff] (!%p252_p9)   ;;  %v1345_v53 = vld [vmem:[%s1759_s3 + $0x8] sm:$0xff] (!%p252_p9)   ;;  %vm655_vm2 = vcmask (!%p252_p9), 261120  }
  0x12   : > { %1220 = vmatpush3.bf16.msra.mxu0 (!%p252_p9), %v1342_v1  ;;  %1255 = vmatprep.subr.bf16.mxu1 (!%p252_p9), %v1344_v52  ;;  %v1573_v54 = vld [vmem:[%s1758_s2] ss:$0 sm:$0xff] (!%p252_p9)  ;;  %s1714_s25 = scalar_lea.hbm (!%p252_p9), %s1763_s7, %s1507_s18  ;;  %s1412_s9 = smov (!%p252_p9), [#allocation3]  }
  0x13   : > { %1291 = vmatprep.subr.msk.bf16.mxu0 (!%p252_p9), %vm419_vm0, %v1343_v2  ;;  %1256 = vmatpush3.bf16.msra.mxu1 (!%p252_p9), %v1344_v52  ;;  %s1350_s10 = sshll.u32 (!%p252_p9), %s1412_s9, 4  ;;  %s1351_s10 = int_to_ptr.vmem [resolvable:$false] %s1350_s10 }
  0x14   : > { %1257 = vmatprep.subr.bf16.mxu1 (!%p252_p9), %v1345_v53  ;;  %s1352_s14 = scalar_lea.vmem (!%p252_p9), %s1351_s10, 64 }
  0x16   : > { %1222 = vmatpush3.bf16.msra.mxu0 (!%p252_p9), %v421_v3 }
  0x17   : > { %1258 = vmatpush3.bf16.msra.mxu1 (!%p252_p9), %v1345_v53 }
  0x18   : > { %s293_s19 = scalar_select %p292_p10, %s1507_s18, 37 }
  0x1a   : > { %s1119_s20 = sshll.u32 %s293_s19, 3  ;;  %s284_s19 = sand.u32 1, %s1400_s27  }
  0x1b   : > { %s1514_s23 = scalar_lea.vmem %s1756_s0, %s1119_s20  ;;  %s1117_s20 = sshll.u32 %s284_s19, 1 }
  0x1c   : > { %v303_v4 = vld [vmem:[%s1514_s23] sm:$0xff]  ;;  %v304_v5 = vld [vmem:[%s1514_s23 + $0x8] sm:$0xff]  ;;  %v305_v6 = vld [vmem:[%s1514_s23 + $0x10] sm:$0xff]  ;;  %s286_s21 = scalar_lea.vmem [#allocation3], %s1117_s20  ;;  %s1040_s6 = scalar_lea.sflag [#allocation4], %s284_s19 }
  0x1d   : > { %v335_v7 = vpack.c.bf16 %v304_v5, %v303_v4  ;;  %v306_v8 = vld [vmem:[%s1514_s23 + $0x18] sm:$0xff]  ;;  %v307_v9 = vld [vmem:[%s1514_s23 + $0x20] sm:$0xff]  ;;  %v308_v10 = vld [vmem:[%s1514_s23 + $0x28] sm:$0xff]  ;;  %s1054_s22 = sshll.u32 %s286_s21, 4  ;;  %s1716_s22 = int_to_ptr.vmem [resolvable:$true] %s1054_s22 }
  0x1e   : > { %v336_v11 = vpack.c.bf16 %v306_v8, %v305_v6  ;;  %v337_v12 = vpack.c.bf16 %v308_v10, %v307_v9  ;;  %v309_v13 = vld [vmem:[%s1514_s23 + $0x30] sm:$0xff]  ;;  %v310_v14 = vld [vmem:[%s1514_s23 + $0x38] sm:$0xff]  ;;  %v311_v15 = vld [vmem:[%s1514_s23 + $0x40] sm:$0xff]  ;;  %s1346_s30 = scalar_lea.vmem %s1716_s22, 32  ;;  %p1353_p0 = scmp.lt.s32.totalorder %s1716_s22, %s1351_s10 }
  0x1f   : > { %1223 = vmatprep.mubr.msk.bf16.mxu0 %vm370_vm1, %v335_v7  ;;  %v312_v16 = vld [vmem:[%s1514_s23 + $0x48] sm:$0xff]  ;;  %v338_v17 = vpack.c.bf16 %v310_v14, %v309_v13  ;;  %v313_v19 = vld [vmem:[%s1514_s23 + $0x50] sm:$0xff]  ;;  %v314_v20 = vld [vmem:[%s1514_s23 + $0x58] sm:$0xff]  ;;  %p1347_p11 = scmp.ne.s32.totalorder %s1716_s22, %s1346_s30  ;;  %p1354_p1 = scmp.lt.s32.totalorder %s1352_s14, %s1346_s30 }
  0x20   : > { %1224 = vmatmul.mubr.msk.bf16.vlgmr.msra.gmra.mrb[0].mxu0 %vm370_vm1, %v336_v11  ;;  %v339_v18 = vpack.c.bf16 %v312_v16, %v311_v15  ;;  %v315_v21 = vld [vmem:[%s1514_s23 + $0x60] sm:$0xff]  ;;  %v316_v22 = vld [vmem:[%s1514_s23 + $0x68] sm:$0xff]  ;;  %v340_v23 = vpack.c.bf16 %v314_v20, %v313_v19  ;;  %v317_v25 = vld [vmem:[%s1514_s23 + $0x70] sm:$0xff] }
  0x21   : > { %1227 = vmatprep.mubr.msk.bf16.mxu0 %vm370_vm1, %v337_v12  ;;  %v341_v24 = vpack.c.bf16 %v316_v22, %v315_v21  ;;  %v318_v26 = vld [vmem:[%s1514_s23 + $0x78] sm:$0xff]  ;;  %v319_v27 = vld [vmem:[%s1514_s23 + $0x80] sm:$0xff]  ;;  %v320_v28 = vld [vmem:[%s1514_s23 + $0x88] sm:$0xff]  ;;  %p1348_p12 = pnand %p1347_p11, %p1491_p5  ;;  %p1355_p2 = por %p1354_p1, %p1353_p0 }
  0x22   : > { %v342_v29 = vpack.c.bf16 %v318_v26, %v317_v25  ;;  %v343_v30 = vpack.c.bf16 %v320_v28, %v319_v27  ;;  %v321_v31 = vld [vmem:[%s1514_s23 + $0x90] sm:$0xff]  ;;  %v322_v32 = vld [vmem:[%s1514_s23 + $0x98] sm:$0xff]  ;;  %v323_v33 = vld [vmem:[%s1514_s23 + $0xa0] sm:$0xff] }
  0x23   : > { %v324_v34 = vld [vmem:[%s1514_s23 + $0xa8] sm:$0xff]  ;;  %v344_v35 = vpack.c.bf16 %v322_v32, %v321_v31  ;;  %v325_v37 = vld [vmem:[%s1514_s23 + $0xb0] sm:$0xff]  ;;  %v326_v38 = vld [vmem:[%s1514_s23 + $0xb8] sm:$0xff]  ;;  %p1349_p13 = pneg %p1348_p12 }
  0x24   : > { %v345_v36 = vpack.c.bf16 %v324_v34, %v323_v33  ;;  %v327_v39 = vld [vmem:[%s1514_s23 + $0xc0] sm:$0xff]  ;;  %v328_v40 = vld [vmem:[%s1514_s23 + $0xc8] sm:$0xff]  ;;  %v346_v41 = vpack.c.bf16 %v326_v38, %v325_v37  ;;  %v329_v43 = vld [vmem:[%s1514_s23 + $0xd0] sm:$0xff] }
  0x25   : > { %v347_v42 = vpack.c.bf16 %v328_v40, %v327_v39  ;;  %v330_v44 = vld [vmem:[%s1514_s23 + $0xd8] sm:$0xff]  ;;  %v331_v45 = vld [vmem:[%s1514_s23 + $0xe0] sm:$0xff]  ;;  %v332_v46 = vld [vmem:[%s1514_s23 + $0xe8] sm:$0xff]  ;;  %p1356_p3 = pnand %p1355_p2, %p1349_p13 }
  0x26   : > { %v348_v47 = vpack.c.bf16 %v330_v44, %v329_v43  ;;  %v349_v48 = vpack.c.bf16 %v332_v46, %v331_v45  ;;  %v333_v49 = vld [vmem:[%s1514_s23 + $0xf0] sm:$0xff]  ;;  %v334_v50 = vld [vmem:[%s1514_s23 + $0xf8] sm:$0xff] }
  0x27   : > { %v350_v51 = vpack.c.bf16 %v334_v50, %v333_v49 }
  0x28   : > { %1228 = vmatmul.mubr.msk.bf16.gmra.mrb[4].mxu0 %vm370_vm1, %v338_v17 }
  0x29   : > { %1231 = vmatprep.mubr.msk.bf16.mxu0 %vm370_vm1, %v339_v18 }
  0x30   : > { %1232 = vmatmul.mubr.msk.bf16.gmra.mrb[8].mxu0 %vm370_vm1, %v340_v23 }
  0x31   : > { %1235 = vmatprep.mubr.msk.bf16.mxu0 %vm370_vm1, %v341_v24 }
  0x38   : > { %1236 = vmatmul.mubr.msk.bf16.gmra.mrb[12].mxu0 %vm370_vm1, %v342_v29 }
  0x39   : > { %1239 = vmatprep.mubr.msk.bf16.mxu0 %vm370_vm1, %v343_v30 }
  0x40   : > { %1240 = vmatmul.mubr.msk.bf16.gmra.mrb[16].mxu0 %vm370_vm1, %v344_v35 }
  0x41   : > { %1243 = vmatprep.mubr.msk.bf16.mxu0 %vm370_vm1, %v345_v36 }
  0x48   : > { %1244 = vmatmul.mubr.msk.bf16.gmra.mrb[20].mxu0 %vm370_vm1, %v346_v41 }
  0x49   : > { %1247 = vmatprep.mubr.msk.bf16.mxu0 %vm370_vm1, %v347_v42 }
  0x50   : > { %1248 = vmatmul.mubr.msk.bf16.gmra.mrb[24].mxu0 %vm370_vm1, %v348_v47 }
  0x51   : > { %1251 = vmatprep.mubr.msk.bf16.mxu0 %vm370_vm1, %v349_v48 }
  0x58   : > { %1252 = vmatmul.mubr.msk.bf16.gmra.mrb[28].mxu0 %vm370_vm1, %v350_v51 }
  0xf3   : > { %v1225_v55 = vpop.f32.mrb[0].mxu0 }
  0xf4   : > { %v466_v56 = vadd.f32 %v1225_v55, %v1573_v54  ;;  %v457_v57 = vpop.f32.mrb[1].mxu0 }
  0xf5   : > { %v458_v58 = vadd.f32 %v1573_v54, %v457_v57  ;;  %v1226_v59 = vpop.f32.mrb[2].mxu0 }
  0xf6   : > { %v469_v60 = vadd.f32 %v1226_v59, %v1573_v54  ;;  %v460_v61 = vpop.f32.mrb[3].mxu0  ;;  %v586_v63 = vmax.f32 %v466_v56, 0.0 }
  0xf7   : > { %v461_v62 = vadd.f32 %v1573_v54, %v460_v61  ;;  %v584_v1 = vmax.f32 %v458_v58, 0.0 }
  0xf8   : > { %v587_v0 = vmax.f32 %v469_v60, 0.0 }
  0xf9   : > { %v585_v2 = vmax.f32 %v461_v62, 0.0 }
  0xfa   : > { %v617_v3 = vpack.c.bf16 %v587_v0, %v586_v63 }
  0xfb   : > { %v1229_v4 = vpop.f32.mrb[4].mxu0  ;;  %v616_v5 = vpack.c.bf16 %v585_v2, %v584_v1 }
  0xfc   : > { %v482_v6 = vadd.f32 %v1229_v4, %v1573_v54  ;;  %v473_v7 = vpop.f32.mrb[5].mxu0 }
  0xfd   : > { %v474_v8 = vadd.f32 %v1573_v54, %v473_v7  ;;  %v1230_v9 = vpop.f32.mrb[6].mxu0  ;;  %1259 = vmatprep.mubr.msk.bf16.mxu1 %vm655_vm2, %v616_v5 }
  0xfe   : > { %v485_v10 = vadd.f32 %v1230_v9, %v1573_v54  ;;  %v476_v11 = vpop.f32.mrb[7].mxu0  ;;  %1260 = vmatmul.mubr.msk.bf16.vlgmr.msra.gmra.mrb[0].mxu1 %vm655_vm2, %v617_v3  ;;  %v590_v13 = vmax.f32 %v482_v6, 0.0 }
  0xff   : > { %v477_v12 = vadd.f32 %v1573_v54, %v476_v11  ;;  %v588_v15 = vmax.f32 %v474_v8, 0.0 }
 0x100   : > { %v591_v14 = vmax.f32 %v485_v10, 0.0 }
 0x101   : > { %v589_v16 = vmax.f32 %v477_v12, 0.0 }
 0x102   : > { %v619_v17 = vpack.c.bf16 %v591_v14, %v590_v13 }
 0x103   : > { %v618_v18 = vpack.c.bf16 %v589_v16, %v588_v15  ;;  %v1233_v19 = vpop.f32.mrb[8].mxu0 }
 0x104   : > { %v498_v20 = vadd.f32 %v1233_v19, %v1573_v54  ;;  %v489_v21 = vpop.f32.mrb[9].mxu0 }
 0x105   : > { %v490_v22 = vadd.f32 %v1573_v54, %v489_v21  ;;  %v1234_v23 = vpop.f32.mrb[10].mxu0  ;;  %1263 = vmatprep.mubr.msk.bf16.mxu1 %vm655_vm2, %v618_v18 }
 0x106   : > { %v501_v24 = vadd.f32 %v1234_v23, %v1573_v54  ;;  %v492_v25 = vpop.f32.mrb[11].mxu0  ;;  %1264 = vmatmul.mubr.msk.bf16.gmra.mrb[4].mxu1 %vm655_vm2, %v619_v17  ;;  %v594_v27 = vmax.f32 %v498_v20, 0.0 }
 0x107   : > { %v493_v26 = vadd.f32 %v1573_v54, %v492_v25  ;;  %v592_v29 = vmax.f32 %v490_v22, 0.0 }
 0x108   : > { %v595_v28 = vmax.f32 %v501_v24, 0.0 }
 0x109   : > { %v593_v30 = vmax.f32 %v493_v26, 0.0 }
 0x10a   : > { %v621_v31 = vpack.c.bf16 %v595_v28, %v594_v27 }
 0x10b   : > { %v620_v32 = vpack.c.bf16 %v593_v30, %v592_v29  ;;  %v1237_v33 = vpop.f32.mrb[12].mxu0 }
 0x10c   : > { %v514_v34 = vadd.f32 %v1237_v33, %v1573_v54  ;;  %v505_v35 = vpop.f32.mrb[13].mxu0 }
 0x10d   : > { %v506_v36 = vadd.f32 %v1573_v54, %v505_v35  ;;  %v1238_v37 = vpop.f32.mrb[14].mxu0  ;;  %1267 = vmatprep.mubr.msk.bf16.mxu1 %vm655_vm2, %v620_v32 }
 0x10e   : > { %v517_v38 = vadd.f32 %v1238_v37, %v1573_v54  ;;  %v508_v39 = vpop.f32.mrb[15].mxu0  ;;  %1268 = vmatmul.mubr.msk.bf16.gmra.mrb[8].mxu1 %vm655_vm2, %v621_v31  ;;  %v598_v41 = vmax.f32 %v514_v34, 0.0 }
 0x10f   : > { %v509_v40 = vadd.f32 %v1573_v54, %v508_v39  ;;  %v596_v43 = vmax.f32 %v506_v36, 0.0 }
 0x110   : > { %v599_v42 = vmax.f32 %v517_v38, 0.0 }
 0x111   : > { %v597_v44 = vmax.f32 %v509_v40, 0.0  ;;  %v1626_v40 = vld [vmem:[%s1761_s5] sm:$0x1] }
 0x112   : > { %v623_v45 = vpack.c.bf16 %v599_v42, %v598_v41  ;;  %1217 = vmatprep.mubr.msk.bf16.mxu0 %vm655_vm2, %v1626_v40  ;;  %v914_v41 = vld [vmem:[#allocation2] sm:$0x1]  ;;  %v1410_v42 = vmov 0  }
 0x113   : > { %v622_v46 = vpack.c.bf16 %v597_v44, %v596_v43  ;;  %v1241_v47 = vpop.f32.mrb[16].mxu0  ;;  %1341 = vset.pattern.permute.xlu0 %v1410_v42 }
 0x114   : > { %v530_v48 = vadd.f32 %v1241_v47, %v1573_v54  ;;  %v521_v49 = vpop.f32.mrb[17].mxu0  ;;  %917 = vperm.xlu0 %1341, %v914_v41  }
 0x115   : > { %v522_v50 = vadd.f32 %v1573_v54, %v521_v49  ;;  %v1242_v51 = vpop.f32.mrb[18].mxu0  ;;  %1271 = vmatprep.mubr.msk.bf16.mxu1 %vm655_vm2, %v622_v46 }
 0x116   : > { %v533_v52 = vadd.f32 %v1242_v51, %v1573_v54  ;;  %v524_v53 = vpop.f32.mrb[19].mxu0  ;;  %1272 = vmatmul.mubr.msk.bf16.gmra.mrb[12].mxu1 %vm655_vm2, %v623_v45  ;;  %v602_v56 = vmax.f32 %v530_v48, 0.0 }
 0x117   : > { %v525_v55 = vadd.f32 %v1573_v54, %v524_v53  ;;  %v600_v58 = vmax.f32 %v522_v50, 0.0 }
 0x118   : > { %v603_v57 = vmax.f32 %v533_v52, 0.0 }
 0x119   : > { %v601_v59 = vmax.f32 %v525_v55, 0.0 }
 0x11a   : > { %v625_v60 = vpack.c.bf16 %v603_v57, %v602_v56 }
 0x11b   : > { %v624_v61 = vpack.c.bf16 %v601_v59, %v600_v58  ;;  %v1245_v62 = vpop.f32.mrb[20].mxu0 }
 0x11c   : > { %v546_v63 = vadd.f32 %v1245_v62, %v1573_v54  ;;  %v537_v0 = vpop.f32.mrb[21].mxu0 }
 0x11d   : > { %v538_v1 = vadd.f32 %v1573_v54, %v537_v0  ;;  %1275 = vmatprep.mubr.msk.bf16.mxu1 %vm655_vm2, %v624_v61  ;;  %v1246_v2 = vpop.f32.mrb[22].mxu0 }
 0x11e   : > { %v606_v3 = vmax.f32 %v546_v63, 0.0  ;;  %v549_v4 = vadd.f32 %v1246_v2, %v1573_v54  ;;  %1276 = vmatmul.mubr.msk.bf16.gmra.mrb[16].mxu1 %vm655_vm2, %v625_v60  ;;  %v540_v5 = vpop.f32.mrb[23].mxu0 }
 0x11f   : > { %v604_v6 = vmax.f32 %v538_v1, 0.0  ;;  %v541_v7 = vadd.f32 %v1573_v54, %v540_v5 }
 0x120   : > { %v607_v8 = vmax.f32 %v549_v4, 0.0 }
 0x121   : > { %v605_v9 = vmax.f32 %v541_v7, 0.0 }
 0x122   : > { %v627_v10 = vpack.c.bf16 %v607_v8, %v606_v3 }
 0x123   : > { %v626_v11 = vpack.c.bf16 %v605_v9, %v604_v6  ;;  %v1249_v12 = vpop.f32.mrb[24].mxu0 }
 0x124   : > { %v562_v13 = vadd.f32 %v1249_v12, %v1573_v54  ;;  %v553_v14 = vpop.f32.mrb[25].mxu0 }
 0x125   : > { %1279 = vmatprep.mubr.msk.bf16.mxu1 %vm655_vm2, %v626_v11  ;;  %v554_v15 = vadd.f32 %v1573_v54, %v553_v14  ;;  %v1250_v16 = vpop.f32.mrb[26].mxu0 }
 0x126   : > { %1280 = vmatmul.mubr.msk.bf16.gmra.mrb[20].mxu1 %vm655_vm2, %v627_v10  ;;  %v610_v17 = vmax.f32 %v562_v13, 0.0  ;;  %v565_v18 = vadd.f32 %v1250_v16, %v1573_v54  ;;  %v556_v19 = vpop.f32.mrb[27].mxu0 }
 0x127   : > { %v608_v20 = vmax.f32 %v554_v15, 0.0  ;;  %v557_v21 = vadd.f32 %v1573_v54, %v556_v19 }
 0x128   : > { %v611_v22 = vmax.f32 %v565_v18, 0.0 }
 0x129   : > { %v609_v23 = vmax.f32 %v557_v21, 0.0 }
 0x12a   : > { %v629_v24 = vpack.c.bf16 %v611_v22, %v610_v17 }
 0x12b   : > { %v628_v25 = vpack.c.bf16 %v609_v23, %v608_v20  ;;  %v1253_v26 = vpop.f32.mrb[28].mxu0 }
 0x12c   : > { %v578_v27 = vadd.f32 %v1253_v26, %v1573_v54  ;;  %v569_v28 = vpop.f32.mrb[29].mxu0 }
 0x12d   : > { %1283 = vmatprep.mubr.msk.bf16.mxu1 %vm655_vm2, %v628_v25  ;;  %v570_v29 = vadd.f32 %v1573_v54, %v569_v28  ;;  %v1254_v30 = vpop.f32.mrb[30].mxu0 }
 0x12e   : > { %1284 = vmatmul.mubr.msk.bf16.gmra.mrb[24].mxu1 %vm655_vm2, %v629_v24  ;;  %v614_v31 = vmax.f32 %v578_v27, 0.0  ;;  %v581_v32 = vadd.f32 %v1254_v30, %v1573_v54  ;;  %v572_v33 = vpop.f32.mrb[31].mxu0 }
 0x12f   : > { %v612_v34 = vmax.f32 %v570_v29, 0.0  ;;  %v573_v35 = vadd.f32 %v1573_v54, %v572_v33  ;;  %v1633_v54 = vld [vmem:[%s1760_s4] ss:$0 sm:$0xff] }
 0x130   : > { %v615_v36 = vmax.f32 %v581_v32, 0.0 }
 0x131   : > { %v613_v37 = vmax.f32 %v573_v35, 0.0 }
 0x132   : > { %v631_v38 = vpack.c.bf16 %v615_v36, %v614_v31 }
 0x133   : > { %v630_v39 = vpack.c.bf16 %v613_v37, %v612_v34 }
 0x135   : > { %1287 = vmatprep.mubr.msk.bf16.mxu1 %vm655_vm2, %v630_v39 }
 0x136   : > { %1288 = vmatmul.mubr.msk.bf16.gmra.mrb[28].mxu1 %vm655_vm2, %v631_v38 }
 0x1d1   : > { %v1261_v43 = vpop.f32.mrb[0].mxu1 }
 0x1d2   : > { %v747_v44 = vadd.f32 %v1261_v43, %v1633_v54  ;;  %v738_v45 = vpop.f32.mrb[1].mxu1 }
 0x1d3   : > { %v739_v46 = vadd.f32 %v1633_v54, %v738_v45  ;;  %v1262_v47 = vpop.f32.mrb[2].mxu1 }
 0x1d4   : > { %v750_v48 = vadd.f32 %v1262_v47, %v1633_v54  ;;  %v741_v49 = vpop.f32.mrb[3].mxu1  ;;  %v867_v51 = vmax.f32 %v747_v44, 0.0 }
 0x1d5   : > { %v742_v50 = vadd.f32 %v1633_v54, %v741_v49  ;;  %v865_v53 = vmax.f32 %v739_v46, 0.0 }
 0x1d6   : > { %v868_v52 = vmax.f32 %v750_v48, 0.0 }
 0x1d7   : > { %v866_v55 = vmax.f32 %v742_v50, 0.0 }
 0x1d8   : > { %v1639_v56 = vpack.c.bf16 %v868_v52, %v867_v51 }
 0x1d9   : > { %v1641_v57 = vpack.c.bf16 %v866_v55, %v865_v53  ;;  %v1265_v58 = vpop.f32.mrb[4].mxu1 }
 0x1da   : > { %v763_v59 = vadd.f32 %v1265_v58, %v1633_v54  ;;  %v754_v60 = vpop.f32.mrb[5].mxu1 }
 0x1db   : > { %v755_v61 = vadd.f32 %v1633_v54, %v754_v60  ;;  %v1266_v62 = vpop.f32.mrb[6].mxu1 }
 0x1dc   : > { %v766_v63 = vadd.f32 %v1266_v62, %v1633_v54  ;;  %v757_v0 = vpop.f32.mrb[7].mxu1  ;;  %v871_v2 = vmax.f32 %v763_v59, 0.0  ;;  %v928_v59 = vsel %vm655_vm2, %v1641_v57, 0  ;;  %v931_v57 = vsel %vm655_vm2, %v1639_v56, 0 }
 0x1dd   : > { %v758_v1 = vadd.f32 %v1633_v54, %v757_v0  ;;  %v869_v4 = vmax.f32 %v755_v61, 0.0 }
 0x1de   : > { %v872_v3 = vmax.f32 %v766_v63, 0.0 }
 0x1df   : > { %v870_v5 = vmax.f32 %v758_v1, 0.0 }
 0x1e0   : > { %v1647_v6 = vpack.c.bf16 %v872_v3, %v871_v2 }
 0x1e1   : > { %v1649_v7 = vpack.c.bf16 %v870_v5, %v869_v4  ;;  %v1269_v8 = vpop.f32.mrb[8].mxu1 }
 0x1e2   : > { %v779_v9 = vadd.f32 %v1269_v8, %v1633_v54  ;;  %v770_v10 = vpop.f32.mrb[9].mxu1 }
 0x1e3   : > { %v771_v11 = vadd.f32 %v1633_v54, %v770_v10  ;;  %v1270_v12 = vpop.f32.mrb[10].mxu1 }
 0x1e4   : > { %v782_v13 = vadd.f32 %v1270_v12, %v1633_v54  ;;  %v773_v14 = vpop.f32.mrb[11].mxu1  ;;  %v875_v16 = vmax.f32 %v779_v9, 0.0 }
 0x1e5   : > { %v774_v15 = vadd.f32 %v1633_v54, %v773_v14  ;;  %v873_v18 = vmax.f32 %v771_v11, 0.0 }
 0x1e6   : > { %v876_v17 = vmax.f32 %v782_v13, 0.0 }
 0x1e7   : > { %v874_v19 = vmax.f32 %v774_v15, 0.0 }
 0x1e8   : > { %v1655_v20 = vpack.c.bf16 %v876_v17, %v875_v16 }
 0x1e9   : > { %v1657_v21 = vpack.c.bf16 %v874_v19, %v873_v18  ;;  %v1273_v22 = vpop.f32.mrb[12].mxu1 }
 0x1ea   : > { %v795_v23 = vadd.f32 %v1273_v22, %v1633_v54  ;;  %v786_v24 = vpop.f32.mrb[13].mxu1 }
 0x1eb   : > { %v787_v25 = vadd.f32 %v1633_v54, %v786_v24  ;;  %v1274_v26 = vpop.f32.mrb[14].mxu1 }
 0x1ec   : > { %v798_v27 = vadd.f32 %v1274_v26, %v1633_v54  ;;  %v789_v28 = vpop.f32.mrb[15].mxu1  ;;  %v879_v30 = vmax.f32 %v795_v23, 0.0 }
 0x1ed   : > { %v790_v29 = vadd.f32 %v1633_v54, %v789_v28  ;;  %v877_v32 = vmax.f32 %v787_v25, 0.0  ;;  %v934_v25 = vsel %vm655_vm2, %v1649_v7, 0  ;;  %v937_v7 = vsel %vm655_vm2, %v1647_v6, 0 }
 0x1ee   : > { %v880_v31 = vmax.f32 %v798_v27, 0.0 }
 0x1ef   : > { %v878_v33 = vmax.f32 %v790_v29, 0.0 }
 0x1f0   : > { %v1663_v34 = vpack.c.bf16 %v880_v31, %v879_v30 }
 0x1f1   : > { %v1665_v35 = vpack.c.bf16 %v878_v33, %v877_v32  ;;  %v1277_v36 = vpop.f32.mrb[16].mxu1 }
 0x1f2   : > { %v811_v37 = vadd.f32 %v1277_v36, %v1633_v54  ;;  %v802_v38 = vpop.f32.mrb[17].mxu1  ;;  %v949_v6 = vsel %vm655_vm2, %v1663_v34, 0 }
 0x1f3   : > { %v803_v39 = vadd.f32 %v1633_v54, %v802_v38  ;;  %v1278_v41 = vpop.f32.mrb[18].mxu1 }
 0x1f4   : > { %v814_v42 = vadd.f32 %v1278_v41, %v1633_v54  ;;  %v805_v43 = vpop.f32.mrb[19].mxu1  ;;  %v883_v45 = vmax.f32 %v811_v37, 0.0  ;;  %v946_v41 = vsel %vm655_vm2, %v1665_v35, 0 }
 0x1f5   : > { %v806_v44 = vadd.f32 %v1633_v54, %v805_v43  ;;  %v881_v47 = vmax.f32 %v803_v39, 0.0  ;;  %v940_v39 = vsel %vm655_vm2, %v1657_v21, 0  ;;  %v920_v21 = vlaneseq }
 0x1f6   : > { %v884_v46 = vmax.f32 %v814_v42, 0.0 }
 0x1f7   : > { %v882_v48 = vmax.f32 %v806_v44, 0.0  ;;  %v921_v42 = vshrl.u32 %v920_v21, 7  ;;  %v1411_v44 = vmov 1966171168   ;;  %vm1036_vm3 = vcmp.lt.s32.totalorder %v920_v21, 256 }
 0x1f8   : > { %v907_v49 = vpack.c.bf16 %v884_v46, %v883_v45  ;;  %v1020_v45 = vunpack.c.l.s4 %v1411_v44 }
 0x1f9   : > { %v906_v50 = vpack.c.bf16 %v882_v48, %v881_v47  ;;  %v1281_v51 = vpop.f32.mrb[20].mxu1  ;;  %v922_v43 = vsub.s32 0, %v921_v42 }
 0x1fa   : > { %v827_v52 = vadd.f32 %v1281_v51, %v1633_v54  ;;  %v818_v53 = vpop.f32.mrb[21].mxu1  ;;  %v1021_v35 = vunpack.c.0.s8 %v1020_v45 }
 0x1fb   : > { %v819_v55 = vadd.f32 %v1633_v54, %v818_v53  ;;  %1292 = vmatprep.subr.msk.bf16.mxu0 %vm655_vm2, %v906_v50  ;;  %v1282_v58 = vpop.f32.mrb[22].mxu1 }
 0x1fc   : > { %v887_v60 = vmax.f32 %v827_v52, 0.0  ;;  %v830_v61 = vadd.f32 %v1282_v58, %v1633_v54  ;;  %1202 = vmatpush3.bf16.xpose.msra.mxu0 %v928_v59  ;;  %v821_v62 = vpop.f32.mrb[23].mxu1  ;;  %v1024_v34 = vsub.s32 %v1021_v35, %v921_v42 }
 0x1fd   : > { %v885_v63 = vmax.f32 %v819_v55, 0.0  ;;  %v822_v0 = vadd.f32 %v1633_v54, %v821_v62  ;;  %1293 = vmatprep.subr.msk.bf16.mxu0 %vm655_vm2, %v907_v49 }
 0x1fe   : > { %v888_v1 = vmax.f32 %v830_v61, 0.0 }
 0x1ff   : > { %v886_v2 = vmax.f32 %v822_v0, 0.0 }
 0x200   : > { %v909_v3 = vpack.c.bf16 %v888_v1, %v887_v60 }
 0x201   : > { %v908_v4 = vpack.c.bf16 %v886_v2, %v885_v63  ;;  %v1285_v5 = vpop.f32.mrb[24].mxu1 }
 0x202   : > { %v843_v8 = vadd.f32 %v1285_v5, %v1633_v54  ;;  %v834_v9 = vpop.f32.mrb[25].mxu1 }
 0x203   : > { %v835_v10 = vadd.f32 %v1633_v54, %v834_v9  ;;  %v1286_v11 = vpop.f32.mrb[26].mxu1 }
 0x204   : > { %1204 = vmatpush3.bf16.xpose.msra.mxu0 %v931_v57  ;;  %v891_v12 = vmax.f32 %v843_v8, 0.0  ;;  %v846_v13 = vadd.f32 %v1286_v11, %v1633_v54  ;;  %v837_v14 = vpop.f32.mrb[27].mxu1 }
 0x205   : > { %1294 = vmatprep.subr.msk.bf16.mxu0 %vm655_vm2, %v908_v4  ;;  %v889_v15 = vmax.f32 %v835_v10, 0.0  ;;  %v838_v16 = vadd.f32 %v1633_v54, %v837_v14 }
 0x206   : > { %v892_v17 = vmax.f32 %v846_v13, 0.0 }
 0x207   : > { %v890_v18 = vmax.f32 %v838_v16, 0.0 }
 0x208   : > { %v911_v19 = vpack.c.bf16 %v892_v17, %v891_v12 }
 0x209   : > { %v910_v22 = vpack.c.bf16 %v890_v18, %v889_v15  ;;  %v1289_v23 = vpop.f32.mrb[28].mxu1 }
 0x20a   : > { %v859_v56 = vadd.f32 %v1289_v23, %v1633_v54  ;;  %v850_v24 = vpop.f32.mrb[29].mxu1 }
 0x20b   : > { %v851_v26 = vadd.f32 %v1633_v54, %v850_v24  ;;  %v1290_v27 = vpop.f32.mrb[30].mxu1 }
 0x20c   : > { %1206 = vmatpush3.bf16.xpose.msra.mxu0 %v934_v25  ;;  %v895_v28 = vmax.f32 %v859_v56, 0.0  ;;  %v862_v29 = vadd.f32 %v1290_v27, %v1633_v54  ;;  %v853_v30 = vpop.f32.mrb[31].mxu1 }
 0x20d   : > { %1295 = vmatprep.subr.msk.bf16.mxu0 %vm655_vm2, %v909_v3  ;;  %v893_v31 = vmax.f32 %v851_v26, 0.0  ;;  %v854_v32 = vadd.f32 %v1633_v54, %v853_v30  ;;  %v943_v54 = vsel %vm655_vm2, %v1655_v20, 0  ;;  %v918_v20 = vpop.permute.xlu0 %917 }
 0x20e   : > { %v896_v33 = vmax.f32 %v862_v29, 0.0  ;;  %v923_v46 = vrot.slane %v918_v20, %v922_v43 }
 0x20f   : > { %v894_v36 = vmax.f32 %v854_v32, 0.0 }
 0x210   : > { %v913_v37 = vpack.c.bf16 %v896_v33, %v895_v28 }
 0x211   : > { %v912_v38 = vpack.c.bf16 %v894_v36, %v893_v31 }
 0x214   : > { %1208 = vmatpush3.bf16.xpose.msra.mxu0 %v937_v7 }
 0x215   : > { %1296 = vmatprep.subr.msk.bf16.mxu0 %vm655_vm2, %v910_v22 }
 0x21c   : > { %1210 = vmatpush3.bf16.xpose.msra.mxu0 %v940_v39 }
 0x21d   : > { %1297 = vmatprep.subr.msk.bf16.mxu0 %vm655_vm2, %v911_v19 }
 0x224   : > { %1212 = vmatpush3.bf16.xpose.msra.mxu0 %v943_v54 }
 0x225   : > { %1298 = vmatprep.subr.msk.bf16.mxu0 %vm655_vm2, %v912_v38 }
 0x22c   : > { %1214 = vmatpush3.bf16.xpose.msra.mxu0 %v946_v41 }
 0x22d   : > { %1299 = vmatprep.subr.msk.bf16.mxu0 %vm655_vm2, %v913_v37 }
 0x234   : > { %1216 = vmatpush3.bf16.xpose.msra.mxu0 %v949_v6 }
 0x23b   : > { %1218 = vmatmul.mubr.msk.bf16.vlgmr.msra.gmra.mrb[32].mxu0 %vm655_vm2, %v1626_v40 }
 0x30e   : > { %v1009_v47 = vpop.f32.mrb[32].mxu0 }
 0x30f   : > { %v1010_v48 = vadd.f32 %v1009_v47, %v923_v46  ;;  %v1011_v49 = vpop.f32.mrb[33].mxu0 }
 0x310   : > { %v1012_v50 = vadd.f32 %v1011_v49, %v923_v46  ;;  %v1013_v51 = vpop.f32.mrb[34].mxu0 }
 0x311   : > { %v1014_v52 = vpop.f32.mrb[35].mxu0 }
 0x312   : > { %v1018_v40 = vcombine.low %v1010_v48, %v1012_v50 }
 0x314   : > { %v1025_v53 = vrot.slane %v1018_v40, %v1024_v34 }
 0x316   : > { %v1032_v55 = vrot.slane %v1025_v53, %v1024_v34 }
 0x318   : > { %1038 = vst.msk [vmem:[%s286_s21] sm:$0x3] %vm1036_vm3, %v1032_v55 }
 0x319   : > { %1359 = shalt.err (!%p1356_p3)
}
 0x31a   : > { %s1360_s18 = scalar_lea.hbm %s1714_s25, 32  ;;  %s1364_s17 = scalar_lea.hbm %s1763_s7, 64 }
 0x31b   : > { %p1361_p4 = scmp.ne.s32.totalorder %s1714_s25, %s1360_s18  ;;  %p1365_p9 = scmp.lt.u32.totalorder %s1714_s25, %s1763_s7 }
 0x31c   : > { %p1366_p10 = scmp.lt.u32.totalorder %s1364_s17, %s1360_s18  ;;  %p1368_p12 = scmp.lt.u32.totalorder %s1360_s18, %s1714_s25 }
 0x31d   : > { %p1362_p7 = pnand %p1361_p4, %p1491_p5 }
 0x31e   : > { %p1367_p11 = por %p1366_p10, %p1365_p9 }
 0x31f   : > { %p1363_p8 = pneg %p1362_p7 }
 0x320   : > { %p1369_p13 = por %p1368_p12, %p1367_p11 }
 0x322   : > { %p1370_p0 = pnand %p1369_p13, %p1363_p8 }
 0x324   : > { %1373 = shalt.err (!%p1370_p0)
}
 0x325   : > { %1300 = dma.vmem_to_hbm [thread:$0]  (%p1491_p5), %s1716_s22, 32, %s1714_s25, %s1040_s6  }
 0x326 PF: > { %p1306_p1 = scmp.ge.s32.totalorder %s1408_s29, 2  ;;  %s1066_s21 = sand.u32 1, %s1396_s26  }
 0x327   : > { %s1067_s23 = scalar_lea.sflag [#allocation4], %s1066_s21 }
 0x328   : > { %p1303_p2 = pnand %p1306_p1, %p1495_p6 }
 0x32a   : > { %1391 = dma.done.wait (!%p1303_p2), %s1067_s23, 32  }
 0x32b   : > { %1393 = vsyncadd (!%p1303_p2), %s1067_s23, 4294967264  ;;  %p19_p3 = scmp.ge.s32.totalorder %s1479_s8, 4   ;;  %s1766_s26 = smov %s1400_s27 }
 0x32c   : > { %s1767_s27 = smov %s1404_s28  ;;  %s1768_s28 = smov %s1489_s11 }
 0x32d   : > { %s1769_s29 = smov %s1479_s8  ;;  %21 = sbr.rel (!%p19_p3) target bundleno = 6 (0x6), region = 83 }
 0x334   :  { %1072 = vsyncpa [#allocation4], 1 }
 0x335   :  { %1074 = vsyncpa [#allocation4 + $0x1], 1 }

</bundles_post_ra>
